<compile_context>
chip_gen: v7x
topology: tpu7x:2x2x1
jax: 0.10.0
libtpu: 0.0.40
codegen_flags: <defaults>
</compile_context>

<pallas_src>
import functools

import jax
import jax.numpy as jnp
from jax import lax
from jax.experimental import pallas as pl
from jax.experimental.pallas import tpu as pltpu

NEG_SLOPE = 0.01          # torch.nn.LeakyReLU default
LANE = 128


def _round_up(x, m):
    return (x + m - 1) // m * m


def _leaky_relu(x):
    return jnp.where(x > 0, x, NEG_SLOPE * x)


def _num_tensorcores():
    """2 only on dual-TensorCore parts (v7x); 1 on single-TC v5e/v6e."""
    try:
        kind = jax.devices()[0].device_kind.lower()
        if "v7" in kind or "7x" in kind:
            return 2
    except Exception:
        pass
    return 1


def _kernel(*refs, widths, offs, batch, tile_b, tiles_per_partial):
    n_layers = len(widths)
    x_ref = refs[0]
    w_refs = refs[1:1 + n_layers]
    bias_ref = refs[1 + n_layers]
    o_ref = refs[2 + n_layers]

    t = pl.program_id(1)

    @pl.when(t == 0)
    def _init():
        o_ref[...] = jnp.zeros_like(o_ref)

    # Single downcast to bf16 for the MXU (a no-op if x already arrives as bf16).
    h = x_ref[...].astype(jnp.bfloat16)

    for li, (w_ref, width, off) in enumerate(zip(w_refs, widths, offs)):
        acc = jnp.dot(h, w_ref[...], preferred_element_type=jnp.float32)
        acc = _leaky_relu(acc + bias_ref[:, off:off + width])     # f32 bias + act
        # bf16 feed for the next MXU matmul; final layer stays f32 for the sum.
        h = acc.astype(jnp.bfloat16) if li + 1 < n_layers else acc

    tile_idx = pl.program_id(0) * tiles_per_partial + t
    row0 = tile_idx * tile_b
    sub = tile_b // 8
    out_w = widths[-1]

    # Full interior tiles: plain sublane-structured sum (no iota/compare/select).
    @pl.when(row0 + tile_b <= batch)
    def _full_tile():
        o_ref[...] += jnp.sum(h.reshape(sub, 8, out_w), axis=0)

    # Only the tile that straddles (or lies past) the batch boundary pays for the
    # row mask.  jnp.where is a select, so unspecified data in the padded edge
    # block (x is NOT padded in HBM) never propagates.
    @pl.when(row0 + tile_b > batch)
    def _edge_tile():
        rows = row0 + lax.broadcasted_iota(jnp.int32, h.shape, 0)
        hm = jnp.where(rows < batch, h, 0.0)
        o_ref[...] += jnp.sum(hm.reshape(sub, 8, out_w), axis=0)


def speech_classifier_forward(x, params, *, tile_b=1024):
    """x: [B, E] float32 (or bfloat16).  params: 5 tuples (w [in,out], b [1,out])."""
    B, E = x.shape
    n_speakers = params[-1][0].shape[1]
    n_layers = len(params)

    # --- pad narrow tail layers to full 128-lane multiples (exact zeros, so the
    #     results are unchanged after the final slice); never pad E/K. ---
    weights, biases, widths = [], [], []
    in_pad = E
    for (w, b) in params:
        fan_in, fan_out = w.shape
        out_pad = _round_up(max(fan_out, LANE), LANE)
        w = jnp.pad(w, ((0, in_pad - fan_in), (0, out_pad - fan_out)))
        b = jnp.pad(jnp.reshape(b, (1, fan_out)), ((0, 0), (0, out_pad - fan_out)))
        weights.append(w.astype(jnp.bfloat16))
        biases.append(b.astype(jnp.float32))
        widths.append(int(out_pad))
        in_pad = out_pad
    widths = tuple(widths)
    offs = tuple(int(sum(widths[:i])) for i in range(n_layers))
    bias_packed = jnp.concatenate(biases, axis=1)     # [1, sum(widths)] lane-aligned
    out_w = widths[-1]

    # --- batch tiling: big tiles to amortize grid-step overhead, clamped by a
    #     rough VMEM budget (x double-buffer + f32/bf16 activation slabs). ---
    tile_b = min(int(tile_b), _round_up(B, 8))
    bytes_per_row = 2 * E * jnp.dtype(x.dtype).itemsize + 6 * sum(widths)
    budget_rows = max(8, (20 * 1024 * 1024 // bytes_per_row) // 8 * 8)
    tile_b = _round_up(max(8, min(tile_b, budget_rows)), 8)

    total_tiles = pl.cdiv(B, tile_b)
    num_partials = 2 if (_num_tensorcores() == 2 and total_tiles >= 2) else 1
    tiles_per_partial = pl.cdiv(total_tiles, num_partials)
    last_tile = total_tiles - 1   # clamp: odd tile counts on the 2-partial path

    kernel = functools.partial(
        _kernel, widths=widths, offs=offs, batch=B, tile_b=tile_b,
        tiles_per_partial=tiles_per_partial)

    const = lambda p, t: (0, 0)
    x_map = lambda p, t: (jnp.minimum(p * tiles_per_partial + t, last_tile), 0)
    in_specs = [pl.BlockSpec((tile_b, E), x_map)]                     # streamed
    in_specs += [pl.BlockSpec(w.shape, const) for w in weights]       # resident
    in_specs += [pl.BlockSpec(bias_packed.shape, const)]              # resident

    partials = pl.pallas_call(
        kernel,
        out_shape=jax.ShapeDtypeStruct((num_partials * 8, out_w), jnp.float32),
        grid_spec=pltpu.PrefetchScalarGridSpec(
            num_scalar_prefetch=0,
            grid=(num_partials, tiles_per_partial),
            in_specs=in_specs,
            out_specs=pl.BlockSpec((8, out_w), lambda p, t: (p, 0)),
        ),
        # On v7x, if profiling shows the leading axis is not sharded across both
        # TensorCores, switch it to pltpu.CORE_PARALLEL; "parallel" is the safe
        # default on all generations.
        compiler_params=pltpu.CompilerParams(
            dimension_semantics=("parallel", "arbitrary"),
            vmem_limit_bytes=32 * 1024 * 1024),
    )(x, *weights, bias_packed)

    # Tiny epilogue in JAX: combine sublane/partial sums, mean over batch, un-pad.
    return (jnp.sum(partials, axis=0) / B)[:n_speakers]


def init_params(key, embedding_dim, n_speakers):
    """Mimics torch.nn.Linear default init (uniform +-1/sqrt(fan_in))."""
    dims = [embedding_dim, 512, 256, 128, 64, n_speakers]
    params = []
    for i in range(len(dims) - 1):
        fan_in, fan_out = dims[i], dims[i + 1]
        key, kw, kb = jax.random.split(key, 3)
        bound = 1.0 / jnp.sqrt(jnp.float32(fan_in))
        w = jax.random.uniform(kw, (fan_in, fan_out), jnp.float32, -bound, bound)
        b = jax.random.uniform(kb, (1, fan_out), jnp.float32, -bound, bound)
        params.append((w, b))
    return params


def reference_forward(x, params):
    """Pure-JAX reference matching the kernel numerics: bf16 weights/activations,
    f32 accumulation, LeakyReLU after every layer (incl. the last, per the spec)."""
    h = x.astype(jnp.bfloat16)
    n = len(params)
    for i, (w, b) in enumerate(params):
        acc = jnp.dot(h, w.astype(jnp.bfloat16),
                      preferred_element_type=jnp.float32) + b.astype(jnp.float32)
        acc = jnp.where(acc > 0, acc, NEG_SLOPE * acc)
        h = acc.astype(jnp.bfloat16) if i + 1 < n else acc
    return jnp.mean(h, axis=0)


if __name__ == "__main__":
    key = jax.random.PRNGKey(0)
    kx, kx2, kp = jax.random.split(key, 3)

    embedding_dim = 32
    n_speakers = 4
    params = init_params(kp, embedding_dim, n_speakers)

    # Case 1: small batch, default tile (single tile, single partial, no mask).
    x = jax.random.normal(kx, (8, embedding_dim), jnp.float32)
    out = jax.block_until_ready(speech_classifier_forward(x, params))
    ref = reference_forward(x, params)
    assert out.shape == (n_speakers,), out.shape
    assert jnp.allclose(out, ref, atol=1e-3, rtol=1e-3), (out, ref)

    # Case 2: ragged batch with a tiny tile — exercises multi-tile accumulation,
    # the unpadded edge block + gated row mask, and (on v7x) two partial sums
    # with an odd tile count (clamped index_map).
    x2 = jax.random.normal(kx2, (20, embedding_dim), jnp.float32)
    out2 = jax.block_until_ready(speech_classifier_forward(x2, params, tile_b=8))
    ref2 = reference_forward(x2, params)
    assert out2.shape == (n_speakers,), out2.shape
    assert jnp.allclose(out2, ref2, atol=1e-3, rtol=1e-3), (out2, ref2)

    # Case 3: ragged batch with the default tile — single partial edge tile.
    out3 = jax.block_until_ready(speech_classifier_forward(x2, params))
    assert jnp.allclose(out3, ref2, atol=1e-3, rtol=1e-3), (out3, ref2)

    print("KERNEL_OK")
</pallas_src>

<mosaic_0001>
module attributes {stable_mosaic.version = 11 : i64} {
  func.func @_kernel(%arg0: i32, %arg1: i32, %arg2: memref<8x32xf32, #tpu.memory_space<vmem>>, %arg3: memref<32x512xbf16, #tpu.memory_space<vmem>>, %arg4: memref<512x256xbf16, #tpu.memory_space<vmem>>, %arg5: memref<256x128xbf16, #tpu.memory_space<vmem>>, %arg6: memref<128x128xbf16, #tpu.memory_space<vmem>>, %arg7: memref<128x128xbf16, #tpu.memory_space<vmem>>, %arg8: memref<1x1152xf32, #tpu.memory_space<vmem>>, %arg9: memref<8x128xf32, #tpu.memory_space<vmem>>) attributes {dimension_semantics = [#tpu.dimension_semantics<parallel>, #tpu.dimension_semantics<arbitrary>], iteration_bounds = array<i64: 1, 1>, scalar_prefetch = 0 : i64, scratch_operands = 0 : i64, tpu.core_type = #tpu.core_type<tc>, window_params = [{transform_indices = @transform_0, window_bounds = array<i64: 8, 32>}, {pipeline_mode = #tpu.pipeline_mode<synchronous>, transform_indices = @transform_1, window_bounds = array<i64: 32, 512>}, {pipeline_mode = #tpu.pipeline_mode<synchronous>, transform_indices = @transform_2, window_bounds = array<i64: 512, 256>}, {pipeline_mode = #tpu.pipeline_mode<synchronous>, transform_indices = @transform_3, window_bounds = array<i64: 256, 128>}, {pipeline_mode = #tpu.pipeline_mode<synchronous>, transform_indices = @transform_4, window_bounds = array<i64: 128, 128>}, {pipeline_mode = #tpu.pipeline_mode<synchronous>, transform_indices = @transform_5, window_bounds = array<i64: 128, 128>}, {pipeline_mode = #tpu.pipeline_mode<synchronous>, transform_indices = @transform_6, window_bounds = array<i64: 1, 1152>}, {transform_indices = @transform_7, window_bounds = array<i64: 8, 128>}]} {
    %c0_i32 = arith.constant 0 : i32
    %0 = arith.cmpi eq, %arg1, %c0_i32 : i32
    %1 = arith.extui %0 : i1 to i32
    %c0_i32_0 = arith.constant 0 : i32
    %2 = arith.cmpi ne, %1, %c0_i32_0 : i32
    scf.if %2 {
      %cst_38 = arith.constant 0.000000e+00 : f32
      %70 = vector.broadcast %cst_38 : f32 to vector<8x128xf32>
      %c0_39 = arith.constant 0 : index
      %c0_40 = arith.constant 0 : index
      %71 = vector.load %arg9[%c0_39, %c0_40] : memref<8x128xf32, #tpu.memory_space<vmem>>, vector<8x128xf32>
      tpu.vector_store %arg9[%c0_39, %c0_40], %70 {strides = array<i32>} : memref<8x128xf32, #tpu.memory_space<vmem>>, vector<8x128xf32>,
    } else {
    }
    %c0 = arith.constant 0 : index
    %c0_1 = arith.constant 0 : index
    %3 = vector.load %arg2[%c0, %c0_1] : memref<8x32xf32, #tpu.memory_space<vmem>>, vector<8x32xf32>
    %4 = arith.truncf %3 : vector<8x32xf32> to vector<8x32xbf16>
    %c0_2 = arith.constant 0 : index
    %c0_3 = arith.constant 0 : index
    %5 = vector.load %arg3[%c0_2, %c0_3] : memref<32x512xbf16, #tpu.memory_space<vmem>>, vector<32x512xbf16>
    %cst = arith.constant dense<0.000000e+00> : vector<8x512xf32>
    %6 = tpu.matmul %4, %5, %cst {dimension_numbers = #tpu.dot_dimension_numbers<[1], [0], [0], [1], [0, 0, 1, 1], [], []>} : vector<8x32xbf16>, vector<32x512xbf16>, vector<8x512xf32> -> vector<8x512xf32>
    %c0_4 = arith.constant 0 : index
    %c0_5 = arith.constant 0 : index
    %7 = vector.load %arg8[%c0_4, %c0_5] : memref<1x1152xf32, #tpu.memory_space<vmem>>, vector<1x512xf32>
    %8 = vector.broadcast %7 : vector<1x512xf32> to vector<8x512xf32>
    %9 = arith.addf %6, %8 : vector<8x512xf32>
    %cst_6 = arith.constant 0.000000e+00 : f32
    %10 = vector.broadcast %cst_6 : f32 to vector<8x512xf32>
    %11 = arith.cmpf ogt, %9, %10 : vector<8x512xf32>
    %cst_7 = arith.constant 0.00999999977 : f32
    %12 = vector.broadcast %cst_7 : f32 to vector<8x512xf32>
    %13 = arith.mulf %12, %9 : vector<8x512xf32>
    %14 = arith.select %11, %9, %13 : vector<8x512xi1>, vector<8x512xf32>
    %15 = arith.truncf %14 : vector<8x512xf32> to vector<8x512xbf16>
    %c0_8 = arith.constant 0 : index
    %c0_9 = arith.constant 0 : index
    %16 = vector.load %arg4[%c0_8, %c0_9] : memref<512x256xbf16, #tpu.memory_space<vmem>>, vector<512x256xbf16>
    %cst_10 = arith.constant dense<0.000000e+00> : vector<8x256xf32>
    %17 = tpu.matmul %15, %16, %cst_10 {dimension_numbers = #tpu.dot_dimension_numbers<[1], [0], [0], [1], [0, 0, 1, 1], [], []>} : vector<8x512xbf16>, vector<512x256xbf16>, vector<8x256xf32> -> vector<8x256xf32>
    %c0_11 = arith.constant 0 : index
    %c512 = arith.constant 512 : index
    %18 = vector.load %arg8[%c0_11, %c512] : memref<1x1152xf32, #tpu.memory_space<vmem>>, vector<1x256xf32>
    %19 = vector.broadcast %18 : vector<1x256xf32> to vector<8x256xf32>
    %20 = arith.addf %17, %19 : vector<8x256xf32>
    %cst_12 = arith.constant 0.000000e+00 : f32
    %21 = vector.broadcast %cst_12 : f32 to vector<8x256xf32>
    %22 = arith.cmpf ogt, %20, %21 : vector<8x256xf32>
    %cst_13 = arith.constant 0.00999999977 : f32
    %23 = vector.broadcast %cst_13 : f32 to vector<8x256xf32>
    %24 = arith.mulf %23, %20 : vector<8x256xf32>
    %25 = arith.select %22, %20, %24 : vector<8x256xi1>, vector<8x256xf32>
    %26 = arith.truncf %25 : vector<8x256xf32> to vector<8x256xbf16>
    %c0_14 = arith.constant 0 : index
    %c0_15 = arith.constant 0 : index
    %27 = vector.load %arg5[%c0_14, %c0_15] : memref<256x128xbf16, #tpu.memory_space<vmem>>, vector<256x128xbf16>
    %cst_16 = arith.constant dense<0.000000e+00> : vector<8x128xf32>
    %28 = tpu.matmul %26, %27, %cst_16 {dimension_numbers = #tpu.dot_dimension_numbers<[1], [0], [0], [1], [0, 0, 1, 1], [], []>} : vector<8x256xbf16>, vector<256x128xbf16>, vector<8x128xf32> -> vector<8x128xf32>
    %c0_17 = arith.constant 0 : index
    %c768 = arith.constant 768 : index
    %29 = vector.load %arg8[%c0_17, %c768] : memref<1x1152xf32, #tpu.memory_space<vmem>>, vector<1x128xf32>
    %30 = vector.broadcast %29 : vector<1x128xf32> to vector<8x128xf32>
    %31 = arith.addf %28, %30 : vector<8x128xf32>
    %cst_18 = arith.constant 0.000000e+00 : f32
    %32 = vector.broadcast %cst_18 : f32 to vector<8x128xf32>
    %33 = arith.cmpf ogt, %31, %32 : vector<8x128xf32>
    %cst_19 = arith.constant 0.00999999977 : f32
    %34 = vector.broadcast %cst_19 : f32 to vector<8x128xf32>
    %35 = arith.mulf %34, %31 : vector<8x128xf32>
    %36 = arith.select %33, %31, %35 : vector<8x128xi1>, vector<8x128xf32>
    %37 = arith.truncf %36 : vector<8x128xf32> to vector<8x128xbf16>
    %c0_20 = arith.constant 0 : index
    %c0_21 = arith.constant 0 : index
    %38 = vector.load %arg6[%c0_20, %c0_21] : memref<128x128xbf16, #tpu.memory_space<vmem>>, vector<128x128xbf16>
    %cst_22 = arith.constant dense<0.000000e+00> : vector<8x128xf32>
    %39 = tpu.matmul %37, %38, %cst_22 {dimension_numbers = #tpu.dot_dimension_numbers<[1], [0], [0], [1], [0, 0, 1, 1], [], []>} : vector<8x128xbf16>, vector<128x128xbf16>, vector<8x128xf32> -> vector<8x128xf32>
    %c0_23 = arith.constant 0 : index
    %c896 = arith.constant 896 : index
    %40 = vector.load %arg8[%c0_23, %c896] : memref<1x1152xf32, #tpu.memory_space<vmem>>, vector<1x128xf32>
    %41 = vector.broadcast %40 : vector<1x128xf32> to vector<8x128xf32>
    %42 = arith.addf %39, %41 : vector<8x128xf32>
    %cst_24 = arith.constant 0.000000e+00 : f32
    %43 = vector.broadcast %cst_24 : f32 to vector<8x128xf32>
    %44 = arith.cmpf ogt, %42, %43 : vector<8x128xf32>
    %cst_25 = arith.constant 0.00999999977 : f32
    %45 = vector.broadcast %cst_25 : f32 to vector<8x128xf32>
    %46 = arith.mulf %45, %42 : vector<8x128xf32>
    %47 = arith.select %44, %42, %46 : vector<8x128xi1>, vector<8x128xf32>
    %48 = arith.truncf %47 : vector<8x128xf32> to vector<8x128xbf16>
    %c0_26 = arith.constant 0 : index
    %c0_27 = arith.constant 0 : index
    %49 = vector.load %arg7[%c0_26, %c0_27] : memref<128x128xbf16, #tpu.memory_space<vmem>>, vector<128x128xbf16>
    %cst_28 = arith.constant dense<0.000000e+00> : vector<8x128xf32>
    %50 = tpu.matmul %48, %49, %cst_28 {dimension_numbers = #tpu.dot_dimension_numbers<[1], [0], [0], [1], [0, 0, 1, 1], [], []>} : vector<8x128xbf16>, vector<128x128xbf16>, vector<8x128xf32> -> vector<8x128xf32>
    %c0_29 = arith.constant 0 : index
    %c1024 = arith.constant 1024 : index
    %51 = vector.load %arg8[%c0_29, %c1024] : memref<1x1152xf32, #tpu.memory_space<vmem>>, vector<1x128xf32>
    %52 = vector.broadcast %51 : vector<1x128xf32> to vector<8x128xf32>
    %53 = arith.addf %50, %52 : vector<8x128xf32>
    %cst_30 = arith.constant 0.000000e+00 : f32
    %54 = vector.broadcast %cst_30 : f32 to vector<8x128xf32>
    %55 = arith.cmpf ogt, %53, %54 : vector<8x128xf32>
    %cst_31 = arith.constant 0.00999999977 : f32
    %56 = vector.broadcast %cst_31 : f32 to vector<8x128xf32>
    %57 = arith.mulf %56, %53 : vector<8x128xf32>
    %58 = arith.select %55, %53, %57 : vector<8x128xi1>, vector<8x128xf32>
    %c1_i32 = arith.constant 1 : i32
    %59 = arith.muli %arg0, %c1_i32 : i32
    %60 = arith.addi %59, %arg1 : i32
    %c8_i32 = arith.constant 8 : i32
    %61 = arith.muli %60, %c8_i32 : i32
    %c8_i32_32 = arith.constant 8 : i32
    %62 = arith.addi %61, %c8_i32_32 : i32
    %c8_i32_33 = arith.constant 8 : i32
    %63 = arith.cmpi sle, %62, %c8_i32_33 : i32
    %64 = arith.extui %63 : i1 to i32
    %c0_i32_34 = arith.constant 0 : i32
    %65 = arith.cmpi ne, %64, %c0_i32_34 : i32
    scf.if %65 {
      %c0_38 = arith.constant 0 : index
      %c0_39 = arith.constant 0 : index
      %70 = vector.load %arg9[%c0_38, %c0_39] : memref<8x128xf32, #tpu.memory_space<vmem>>, vector<8x128xf32>
      %71 = vector.shape_cast %58 : vector<8x128xf32> to vector<1x8x128xf32>
      %cst_40 = arith.constant dense<0.000000e+00> : vector<8x128xf32>
      %72 = vector.multi_reduction <add>, %71, %cst_40 [0] : vector<1x8x128xf32> to vector<8x128xf32>
      %73 = arith.addf %70, %72 : vector<8x128xf32>
      %c0_41 = arith.constant 0 : index
      %c0_42 = arith.constant 0 : index
      %74 = vector.load %arg9[%c0_41, %c0_42] : memref<8x128xf32, #tpu.memory_space<vmem>>, vector<8x128xf32>
      tpu.vector_store %arg9[%c0_41, %c0_42], %73 {strides = array<i32>} : memref<8x128xf32, #tpu.memory_space<vmem>>, vector<8x128xf32>,
    } else {
    }
    %c8_i32_35 = arith.constant 8 : i32
    %66 = arith.addi %61, %c8_i32_35 : i32
    %c8_i32_36 = arith.constant 8 : i32
    %67 = arith.cmpi sgt, %66, %c8_i32_36 : i32
    %68 = arith.extui %67 : i1 to i32
    %c0_i32_37 = arith.constant 0 : i32
    %69 = arith.cmpi ne, %68, %c0_i32_37 : i32
    scf.if %69 {
      %70 = tpu.iota {dimensions = array<i32: 0>} : vector<8x128xi32>
      %71 = vector.broadcast %61 : i32 to vector<8x128xi32>
      %72 = arith.addi %71, %70 : vector<8x128xi32>
      %c8_i32_38 = arith.constant 8 : i32
      %73 = vector.broadcast %c8_i32_38 : i32 to vector<8x128xi32>
      %74 = arith.cmpi slt, %72, %73 : vector<8x128xi32>
      %cst_39 = arith.constant 0.000000e+00 : f32
      %75 = vector.broadcast %cst_39 : f32 to vector<8x128xf32>
      %76 = arith.select %74, %58, %75 : vector<8x128xi1>, vector<8x128xf32>
      %c0_40 = arith.constant 0 : index
      %c0_41 = arith.constant 0 : index
      %77 = vector.load %arg9[%c0_40, %c0_41] : memref<8x128xf32, #tpu.memory_space<vmem>>, vector<8x128xf32>
      %78 = vector.shape_cast %76 : vector<8x128xf32> to vector<1x8x128xf32>
      %cst_42 = arith.constant dense<0.000000e+00> : vector<8x128xf32>
      %79 = vector.multi_reduction <add>, %78, %cst_42 [0] : vector<1x8x128xf32> to vector<8x128xf32>
      %80 = arith.addf %77, %79 : vector<8x128xf32>
      %c0_43 = arith.constant 0 : index
      %c0_44 = arith.constant 0 : index
      %81 = vector.load %arg9[%c0_43, %c0_44] : memref<8x128xf32, #tpu.memory_space<vmem>>, vector<8x128xf32>
      tpu.vector_store %arg9[%c0_43, %c0_44], %80 {strides = array<i32>} : memref<8x128xf32, #tpu.memory_space<vmem>>, vector<8x128xf32>,
    } else {
    }
    return
  }
  func.func @transform_0(%arg0: i32, %arg1: i32) -> (i32, i32) {
    %c1_i32 = arith.constant 1 : i32
    %0 = arith.muli %arg0, %c1_i32 : i32
    %1 = arith.addi %0, %arg1 : i32
    %c0_i32 = arith.constant 0 : i32
    %2 = arith.minsi %1, %c0_i32 : i32
    %c0_i32_0 = arith.constant 0 : i32
    %c0_i32_1 = arith.constant 0 : i32
    return %2, %c0_i32_0 : i32, i32
  }
  func.func @transform_1(%arg0: i32, %arg1: i32) -> (i32, i32) {
    %c0_i32 = arith.constant 0 : i32
    %c0_i32_0 = arith.constant 0 : i32
    %c0_i32_1 = arith.constant 0 : i32
    return %c0_i32, %c0_i32_0 : i32, i32
  }
  func.func @transform_2(%arg0: i32, %arg1: i32) -> (i32, i32) {
    %c0_i32 = arith.constant 0 : i32
    %c0_i32_0 = arith.constant 0 : i32
    %c0_i32_1 = arith.constant 0 : i32
    return %c0_i32, %c0_i32_0 : i32, i32
  }
  func.func @transform_3(%arg0: i32, %arg1: i32) -> (i32, i32) {
    %c0_i32 = arith.constant 0 : i32
    %c0_i32_0 = arith.constant 0 : i32
    %c0_i32_1 = arith.constant 0 : i32
    return %c0_i32, %c0_i32_0 : i32, i32
  }
  func.func @transform_4(%arg0: i32, %arg1: i32) -> (i32, i32) {
    %c0_i32 = arith.constant 0 : i32
    %c0_i32_0 = arith.constant 0 : i32
    %c0_i32_1 = arith.constant 0 : i32
    return %c0_i32, %c0_i32_0 : i32, i32
  }
  func.func @transform_5(%arg0: i32, %arg1: i32) -> (i32, i32) {
    %c0_i32 = arith.constant 0 : i32
    %c0_i32_0 = arith.constant 0 : i32
    %c0_i32_1 = arith.constant 0 : i32
    return %c0_i32, %c0_i32_0 : i32, i32
  }
  func.func @transform_6(%arg0: i32, %arg1: i32) -> (i32, i32) {
    %c0_i32 = arith.constant 0 : i32
    %c0_i32_0 = arith.constant 0 : i32
    %c0_i32_1 = arith.constant 0 : i32
    return %c0_i32, %c0_i32_0 : i32, i32
  }
  func.func @transform_7(%arg0: i32, %arg1: i32) -> (i32, i32) {
    %c0_i32 = arith.constant 0 : i32
    %c0_i32_0 = arith.constant 0 : i32
    return %arg0, %c0_i32 : i32, i32
  }
}

</mosaic_0001>

<bundles_post_ra>
// kernel: tpu_custom_call.1
= control target key start
LH: loop header
LB: loop body
LE: loop exit
PB: predicated region body
PF: predicated region fallthrough
CT: control target
= control target key end

     0   :  { %12 = vsyncpa [#allocation3], 0  ;;  %s1972_s0 = inlined_call_operand.hbm [shape: f32[8,32], index: 0, kind: input, shape index: {}]   ;;  %s1973_s1 = inlined_call_operand.hbm [shape: bf16[32,512], index: 1, kind: input, shape index: {}]   ;;  %s1974_s2 = inlined_call_operand.hbm [shape: bf16[512,256], index: 2, kind: input, shape index: {}]   ;;  %s1975_s3 = inlined_call_operand.hbm [shape: bf16[256,128], index: 3, kind: input, shape index: {}]   ;;  %s1976_s4 = inlined_call_operand.hbm [shape: bf16[128,128], index: 4, kind: input, shape index: {}]   ;;  %s1977_s5 = inlined_call_operand.hbm [shape: bf16[128,128], index: 5, kind: input, shape index: {}]   ;;  %s1978_s6 = inlined_call_operand.vmem [shape: f32[1,1152], index: 6, kind: input, shape index: {}]   ;;  %s1979_s7 = inlined_call_operand.hbm [shape: f32[8,128], index: 7, kind: output, shape index: {}]  }
   0x1   :  { %13 = vsyncpa [#allocation6], 0 }
   0x2   :  { %14 = vsyncpa [#allocation9], 0 }
   0x3   :  { %15 = vsyncpa [#allocation12], 0 }
   0x4   :  { %16 = vsyncpa [#allocation4], 0  ;;  %s1749_s24 = smov [#allocation5]   ;;  %s1585_s28 = scalar_lea.hbm %s1973_s1, 1024 }
   0x5   :  { %s37_s25 = sshll.u32 %s1749_s24, 4  ;;  %p1586_p0 = scmp.ne.s32.totalorder %s1973_s1, %s1585_s28  ;;  %s38_s25 = int_to_ptr.vmem [resolvable:$true] %s37_s25 }
   0x6   :  { %p1589_p1 = scmp.lt.u32.totalorder %s1585_s28, %s1973_s1 }
   0x8   :  { %p1591_p2 = pnand %p1589_p1, %p1586_p0 }
   0xa   :  { %1594 = shalt.err (!%p1591_p2)
}
   0xb   :  { %s1595_s10 = scalar_lea.vmem %s38_s25, 1024  ;;  %p1600_p4 = scmp.lt.s32.totalorder %s38_s25, %s38_s25 }
   0xc   :  { %p1596_p3 = scmp.ne.s32.totalorder %s38_s25, %s1595_s10  ;;  %p1601_p5 = scmp.lt.s32.totalorder %s1595_s10, %s1595_s10 }
   0xe   :  { %p1602_p6 = por %p1601_p5, %p1600_p4 }
  0x10   :  { %p1603_p7 = pnand %p1602_p6, %p1596_p3 }
  0x12   :  { %1606 = shalt.err (!%p1603_p7)
}
  0x13   :  { %s1750_s11 = smov 256   ;;  %s1751_s12 = smov 16  }
  0x14   :  { %43 = dma.hbm_to_vmem [thread:$0]  %s1973_s1, 1024, %s38_s25, [#allocation6], %s1750_s11, %s1750_s11, %s1751_s12  }
  0x15   :  { %s1752_s15 = smov [#allocation8]   ;;  %s1607_s19 = scalar_lea.hbm %s1975_s3, 2048 }
  0x16   :  { %s61_s16 = sshll.u32 %s1752_s15, 4  ;;  %p1608_p8 = scmp.ne.s32.totalorder %s1975_s3, %s1607_s19  ;;  %s62_s16 = int_to_ptr.vmem [resolvable:$true] %s61_s16 }
  0x17   :  { %p1611_p9 = scmp.lt.u32.totalorder %s1607_s19, %s1975_s3 }
  0x19   :  { %p1613_p10 = pnand %p1611_p9, %p1608_p8 }
  0x1b   :  { %1616 = shalt.err (!%p1613_p10)
}
  0x1c   :  { %s1617_s24 = scalar_lea.vmem %s62_s16, 2048  ;;  %p1622_p12 = scmp.lt.s32.totalorder %s62_s16, %s62_s16 }
  0x1d   :  { %p1618_p11 = scmp.ne.s32.totalorder %s62_s16, %s1617_s24  ;;  %p1623_p13 = scmp.lt.s32.totalorder %s1617_s24, %s1617_s24 }
  0x1f   :  { %p1624_p0 = por %p1623_p13, %p1622_p12 }
  0x21   :  { %p1625_p1 = pnand %p1624_p0, %p1618_p11 }
  0x23   :  { %1628 = shalt.err (!%p1625_p1)
}
  0x24   :  { %s1753_s1 = smov 64   ;;  %s1754_s25 = smov 4  }
  0x25   :  { %67 = dma.hbm_to_vmem [thread:$0]  %s1975_s3, 2048, %s62_s16, [#allocation9], %s1753_s1, %s1753_s1, %s1754_s25  }
  0x26   :  { %s1755_s28 = smov [#allocation2]   ;;  %s1756_s30 = smov [#allocation7]  }
  0x27   :  { %s28_s29 = sshll.u32 %s1755_s28, 4  ;;  %s49_s8 = sshll.u32 %s1756_s30, 4  ;;  %s29_s29 = int_to_ptr.vmem [resolvable:$true] %s28_s29  ;;  %s1832_s8 = int_to_ptr.vmem [resolvable:$true] %s49_s8 }
  0x28   :  { %s1629_s11 = scalar_lea.hbm %s1972_s0, 128 }
  0x29   :  { %p1630_p2 = scmp.ne.s32.totalorder %s1972_s0, %s1629_s11  ;;  %p1633_p3 = scmp.lt.u32.totalorder %s1629_s11, %s1972_s0 }
  0x2b   :  { %p1635_p4 = pnand %p1633_p3, %p1630_p2 }
  0x2d   :  { %1638 = shalt.err (!%p1635_p4)
}
  0x2e   :  { %s1639_s3 = scalar_lea.vmem %s29_s29, 128  ;;  %p1644_p6 = scmp.lt.s32.totalorder %s29_s29, %s29_s29 }
  0x2f   :  { %p1640_p5 = scmp.ne.s32.totalorder %s29_s29, %s1639_s3  ;;  %p1645_p7 = scmp.lt.s32.totalorder %s1639_s3, %s1639_s3 }
  0x31   :  { %p1646_p8 = por %p1645_p7, %p1644_p6 }
  0x33   :  { %p1647_p9 = pnand %p1646_p8, %p1640_p5 }
  0x35   :  { %1650 = shalt.err (!%p1647_p9)
}
  0x36   :  { %31 = dma.hbm_to_vmem [thread:$0]  %s1972_s0, 128, %s29_s29, [#allocation3]  }
  0x37   :  { %s1651_s20 = scalar_lea.hbm %s1974_s2, 8192 }
  0x38   :  { %p1652_p10 = scmp.ne.s32.totalorder %s1974_s2, %s1651_s20  ;;  %p1655_p11 = scmp.lt.u32.totalorder %s1651_s20, %s1974_s2 }
  0x3a   :  { %p1657_p12 = pnand %p1655_p11, %p1652_p10 }
  0x3c   :  { %1660 = shalt.err (!%p1657_p12)
}
  0x3d   :  { %s1661_s26 = scalar_lea.vmem %s1832_s8, 8192  ;;  %p1666_p0 = scmp.lt.s32.totalorder %s1832_s8, %s1832_s8 }
  0x3e   :  { %p1662_p13 = scmp.ne.s32.totalorder %s1832_s8, %s1661_s26  ;;  %p1667_p1 = scmp.lt.s32.totalorder %s1661_s26, %s1661_s26 }
  0x40   :  { %p1668_p2 = por %p1667_p1, %p1666_p0 }
  0x42   :  { %p1669_p3 = pnand %p1668_p2, %p1662_p13 }
  0x44   :  { %1672 = shalt.err (!%p1669_p3)
}
  0x45   :  { %s1757_s0 = smov 128   ;;  %s1758_s27 = smov 8  }
  0x46   :  { %55 = dma.hbm_to_vmem [thread:$0]  %s1974_s2, 8192, %s1832_s8, [#allocation6], %s1757_s0, %s1757_s0, %s1758_s27  }
  0x47   :  { %s1759_s30 = smov [#allocation10]   ;;  %s1760_s10 = smov [#allocation11]  }
  0x48   :  { %s73_s9 = sshll.u32 %s1759_s30, 4  ;;  %s85_s11 = sshll.u32 %s1760_s10, 4  ;;  %s74_s9 = int_to_ptr.vmem [resolvable:$true] %s73_s9  ;;  %s1863_s11 = int_to_ptr.vmem [resolvable:$true] %s85_s11 }
  0x49   :  { %s1673_s14 = scalar_lea.hbm %s1976_s4, 1024 }
  0x4a   :  { %p1674_p4 = scmp.ne.s32.totalorder %s1976_s4, %s1673_s14  ;;  %p1677_p5 = scmp.lt.u32.totalorder %s1673_s14, %s1976_s4 }
  0x4c   :  { %p1679_p6 = pnand %p1677_p5, %p1674_p4 }
  0x4e   :  { %1682 = shalt.err (!%p1679_p6)
}
  0x4f   :  { %s1683_s2 = scalar_lea.vmem %s74_s9, 1024  ;;  %p1688_p8 = scmp.lt.s32.totalorder %s74_s9, %s74_s9 }
  0x50   :  { %p1684_p7 = scmp.ne.s32.totalorder %s74_s9, %s1683_s2  ;;  %p1689_p9 = scmp.lt.s32.totalorder %s1683_s2, %s1683_s2 }
  0x52   :  { %p1690_p10 = por %p1689_p9, %p1688_p8 }
  0x54   :  { %p1691_p11 = pnand %p1690_p10, %p1684_p7 }
  0x56   :  { %1694 = shalt.err (!%p1691_p11)
}
  0x57   :  { %79 = dma.hbm_to_vmem [thread:$0]  %s1976_s4, 1024, %s74_s9, [#allocation9], %s1753_s1, %s1753_s1, %s1754_s25  }
  0x58   :  { %s1695_s21 = scalar_lea.hbm %s1977_s5, 1024 }
  0x59   :  { %p1696_p12 = scmp.ne.s32.totalorder %s1977_s5, %s1695_s21  ;;  %p1699_p13 = scmp.lt.u32.totalorder %s1695_s21, %s1977_s5 }
  0x5b   :  { %p1701_p0 = pnand %p1699_p13, %p1696_p12 }
  0x5d   :  { %1704 = shalt.err (!%p1701_p0)
}
  0x5e   :  { %s1705_s0 = scalar_lea.vmem %s1863_s11, 1024  ;;  %p1710_p2 = scmp.lt.s32.totalorder %s1863_s11, %s1863_s11 }
  0x5f   :  { %p1706_p1 = scmp.ne.s32.totalorder %s1863_s11, %s1705_s0  ;;  %p1711_p3 = scmp.lt.s32.totalorder %s1705_s0, %s1705_s0 }
  0x61   :  { %p1712_p4 = por %p1711_p3, %p1710_p2 }
  0x63   :  { %p1713_p5 = pnand %p1712_p4, %p1706_p1 }
  0x65   :  { %1716 = shalt.err (!%p1713_p5)
}
  0x66   :  { %91 = dma.hbm_to_vmem [thread:$0]  %s1977_s5, 1024, %s1863_s11, [#allocation12], %s1753_s1, %s1753_s1, %s1754_s25  }
  0x67   :  { %1739 = dma.done.wait [#allocation3], 128  }
  0x68   :  { %1740 = vsyncadd [#allocation3], 4294967168 }
  0x69   :  { %1741 = dma.done.wait [#allocation6], 9216  }
  0x6a   :  { %1742 = vsyncadd [#allocation6], 4294958080 }
  0x6b   :  { %1743 = dma.done.wait [#allocation9], 3072  }
  0x6c   :  { %1744 = vsyncadd [#allocation9], 4294964224 }
  0x6d   :  { %1745 = dma.done.wait [#allocation12], 1024  }
  0x6e   :  { %1746 = vsyncadd [#allocation12], 4294966272  ;;  %v1761_v0 = vmov 0   ;;  %v1445_v1 = vld [vmem:[#allocation5 + $0x4] ss:$16 sps:$4 sm:$0xff]   ;;  %v121_v5 = vld [vmem:[#allocation2] sm:$0xff]  ;;  %v133_v56 = vlaneseq }
  0x6f   :  { %229 = vmatprep.mubr.bf16.mxu1 %v1761_v0  ;;  %v1447_v2 = vld [vmem:[#allocation5] ss:$16 sps:$4 sm:$0xff]   ;;  %197 = vmatprep.subr.bf16.mxu1 %v1445_v1  ;;  %v1448_v3 = vld [vmem:[#allocation5 + $0x24] ss:$16 sps:$4 sm:$0xff]   ;;  %v1453_v6 = vld [vmem:[#allocation5 + $0xc] ss:$16 sps:$4 sm:$0xff]   ;;  %v122_v8 = vpack.c.bf16 %v121_v5, %v121_v5 }
  0x70   :  { %v1450_v4 = vld [vmem:[#allocation5 + $0x20] ss:$16 sps:$4 sm:$0xff]   ;;  %198 = vmatpush1.bf16.msra.mxu1 %v1447_v2  ;;  %v1451_v7 = vld [vmem:[#allocation5 + $0x8] ss:$16 sps:$4 sm:$0xff]   ;;  %v1457_v9 = vld [vmem:[#allocation7 + $0x4] ss:$8 sps:$4 sm:$0xff]  }
  0x71   :  { %199 = vmatprep.subr.bf16.mxu1 %v1448_v3  ;;  %v1459_v10 = vld [vmem:[#allocation7] ss:$8 sps:$4 sm:$0xff]   ;;  %vm193_vm0 = vcmask 261120   ;;  %v1460_v11 = vld [vmem:[#allocation7 + $0x14] ss:$8 sps:$4 sm:$0xff]   ;;  %691 = vmatprep.subr.bf16.mxu0 %v1457_v9  ;;  %v1902_v57 = vshrl.u32 %v133_v56, 7 }
  0x72   :  { %v1456_v12 = vld [vmem:[#allocation5 + $0x2c] ss:$16 sps:$4 sm:$0xff]   ;;  %692 = vmatpush1.bf16.msra.mxu0 %v1459_v10  ;;  %v1462_v13 = vld [vmem:[#allocation7 + $0x10] ss:$8 sps:$4 sm:$0xff]   ;;  %v1465_v16 = vld [vmem:[#allocation7 + $0x20] ss:$8 sps:$4 sm:$0xff]  }
  0x73   :  { %693 = vmatprep.subr.bf16.mxu0 %v1460_v11  ;;  %v1463_v14 = vld [vmem:[#allocation7 + $0x24] ss:$8 sps:$4 sm:$0xff]   ;;  %v1454_v15 = vld [vmem:[#allocation5 + $0x28] ss:$16 sps:$4 sm:$0xff]   ;;  %v1466_v17 = vld [vmem:[#allocation7 + $0x34] ss:$8 sps:$4 sm:$0xff]  }
  0x74   :  { %200 = vmatpush1.bf16.msra.mxu1 %v1450_v4  ;;  %v1468_v18 = vld [vmem:[#allocation7 + $0x30] ss:$8 sps:$4 sm:$0xff]   ;;  %v1469_v19 = vld [vmem:[#allocation7 + $0x44] ss:$8 sps:$4 sm:$0xff]   ;;  %v1471_v20 = vld [vmem:[#allocation7 + $0x40] ss:$8 sps:$4 sm:$0xff]  }
  0x75   :  { %238 = vmatprep.subr.bf16.mxu1 %v1453_v6  ;;  %v1472_v21 = vld [vmem:[#allocation7 + $0x54] ss:$8 sps:$4 sm:$0xff]   ;;  %v1474_v22 = vld [vmem:[#allocation7 + $0x50] ss:$8 sps:$4 sm:$0xff]   ;;  %v1475_v23 = vld [vmem:[#allocation7 + $0x64] ss:$8 sps:$4 sm:$0xff]  }
  0x76   :  { %694 = vmatpush1.bf16.msra.mxu0 %v1462_v13  ;;  %v1477_v24 = vld [vmem:[#allocation7 + $0x60] ss:$8 sps:$4 sm:$0xff]   ;;  %v1478_v25 = vld [vmem:[#allocation7 + $0x74] ss:$8 sps:$4 sm:$0xff]   ;;  %v1480_v26 = vld [vmem:[#allocation7 + $0x70] ss:$8 sps:$4 sm:$0xff]  }
  0x77   :  { %1242 = vmatmul.mubr.msk.bf16.vlgmr.msra.gmra.mrb[0].mxu1 %vm193_vm0, %v122_v8  ;;  %695 = vmatprep.subr.bf16.mxu0 %v1463_v14  ;;  %v1481_v27 = vld [vmem:[#allocation7 + $0x84] ss:$8 sps:$4 sm:$0xff]   ;;  %v1483_v28 = vld [vmem:[#allocation7 + $0x80] ss:$8 sps:$4 sm:$0xff]   ;;  %v1484_v29 = vld [vmem:[#allocation7 + $0x94] ss:$8 sps:$4 sm:$0xff]  }
  0x78   :  { %239 = vmatpush1.bf16.msra.mxu1 %v1451_v7  ;;  %270 = vmatprep.mubr.bf16.mxu1 %v1761_v0  ;;  %v1486_v30 = vld [vmem:[#allocation7 + $0x90] ss:$8 sps:$4 sm:$0xff]   ;;  %v1487_v31 = vld [vmem:[#allocation7 + $0xa4] ss:$8 sps:$4 sm:$0xff]   ;;  %v1489_v32 = vld [vmem:[#allocation7 + $0xa0] ss:$8 sps:$4 sm:$0xff]  }
  0x79   :  { %240 = vmatprep.subr.bf16.mxu1 %v1456_v12  ;;  %v1490_v33 = vld [vmem:[#allocation7 + $0xb4] ss:$8 sps:$4 sm:$0xff]   ;;  %v1492_v34 = vld [vmem:[#allocation7 + $0xb0] ss:$8 sps:$4 sm:$0xff]   ;;  %v1493_v35 = vld [vmem:[#allocation7 + $0xc4] ss:$8 sps:$4 sm:$0xff]  }
  0x7a   :  { %696 = vmatpush1.bf16.msra.mxu0 %v1465_v16  ;;  %v1495_v36 = vld [vmem:[#allocation7 + $0xc0] ss:$8 sps:$4 sm:$0xff]   ;;  %v1496_v37 = vld [vmem:[#allocation7 + $0xd4] ss:$8 sps:$4 sm:$0xff]   ;;  %v1498_v38 = vld [vmem:[#allocation7 + $0xd0] ss:$8 sps:$4 sm:$0xff]  }
  0x7b   :  { %697 = vmatprep.subr.bf16.mxu0 %v1466_v17  ;;  %v1499_v39 = vld [vmem:[#allocation7 + $0xe4] ss:$8 sps:$4 sm:$0xff]   ;;  %v1501_v40 = vld [vmem:[#allocation7 + $0xe0] ss:$8 sps:$4 sm:$0xff]   ;;  %v1502_v41 = vld [vmem:[#allocation7 + $0xf4] ss:$8 sps:$4 sm:$0xff]  }
  0x7c   :  { %241 = vmatpush1.bf16.msra.mxu1 %v1454_v15  ;;  %v1504_v42 = vld [vmem:[#allocation7 + $0xf0] ss:$8 sps:$4 sm:$0xff]   ;;  %v1507_v43 = vld [vmem:[#allocation7 + $0x104] ss:$8 sps:$4 sm:$0xff]   ;;  %v135_v58 = vsub.s32 0, %v1902_v57  ;;  %v139_v60 = vsub.s32 1, %v1902_v57 }
  0x7d   :  { %v1553_v44 = vld [vmem:[#allocation8 + $0x40] sm:$0xff]   ;;  %v1555_v46 = vld [vmem:[#allocation8 + $0x48] sm:$0xff]   ;;  %v1557_v48 = vld [vmem:[#allocation8 + $0x50] sm:$0xff]   ;;  %v147_v4 = vsub.s32 3, %v1902_v57  ;;  %vm1763_vm7 = vmmov 0   ;;  %s1764_s13 = smov [#allocation13]  }
  0x7e   :  { %698 = vmatpush1.bf16.msra.mxu0 %v1468_v18  ;;  %v1554_v45 = vld [vmem:[#allocation8] sm:$0xff]   ;;  %1343 = vmatprep.subr.bf16.mxu1 %v1553_v44  ;;  %v1556_v47 = vld [vmem:[#allocation8 + $0x8] sm:$0xff]   ;;  %v1558_v49 = vld [vmem:[#allocation8 + $0x10] sm:$0xff]   ;;  %s1220_s14 = sshll.u32 %s1764_s13, 4  ;;  %s1221_s14 = int_to_ptr.vmem [resolvable:$true] %s1220_s14 }
  0x7f   :  { %1243 = vmatmul.mubr.msk.bf16.vlgmr.msra.gmra.mrb[4].mxu1 %vm193_vm0, %v122_v8  ;;  %699 = vmatprep.subr.bf16.mxu0 %v1469_v19  ;;  %v1559_v50 = vld [vmem:[#allocation8 + $0x58] sm:$0xff]   ;;  %v1561_v52 = vld [vmem:[#allocation8 + $0x60] sm:$0xff]   ;;  %v1563_v54 = vld [vmem:[#allocation8 + $0x68] sm:$0xff]   ;;  %s1717_s15 = scalar_lea.vmem %s1221_s14, 128  ;;  %p1722_p7 = scmp.lt.s32.totalorder %s1221_s14, %s1221_s14 }
  0x80   :  { %1344 = vmatpush3.bf16.msra.mxu1 %v1554_v45  ;;  %v1560_v51 = vld [vmem:[#allocation8 + $0x18] sm:$0xff]   ;;  %v1562_v53 = vld [vmem:[#allocation8 + $0x20] sm:$0xff]   ;;  %v1564_v55 = vld [vmem:[#allocation8 + $0x28] sm:$0xff]   ;;  %v143_v45 = vsub.s32 2, %v1902_v57  ;;  %p1718_p6 = scmp.ne.s32.totalorder %s1221_s14, %s1717_s15  ;;  %p1723_p8 = scmp.lt.s32.totalorder %s1717_s15, %s1717_s15 }
  0x81   :  { %1345 = vmatprep.subr.bf16.mxu1 %v1555_v46  ;;  %v1908_v59 = vld [vmem:[%s1978_s6] sm:$0xf]  ;;  %v1510_v14 = vld [vmem:[#allocation7 + $0x114] ss:$8 sps:$4 sm:$0xff]   ;;  %v1508_v19 = vld [vmem:[#allocation7 + $0x110] ss:$8 sps:$4 sm:$0xff]  }
  0x82   :  { %700 = vmatpush1.bf16.msra.mxu0 %v1471_v20  ;;  %v136_v61 = vrot.slane %v1908_v59, %v135_v58  ;;  %v140_v62 = vrot.slane %v1908_v59, %v139_v60  ;;  %v148_v10 = vrot.slane %v1908_v59, %v147_v4  ;;  %v1505_v12 = vld [vmem:[#allocation7 + $0x100] ss:$8 sps:$4 sm:$0xff]   ;;  %v1543_v44 = vld [vmem:[#allocation7 + $0x1c4] ss:$8 sps:$4 sm:$0xff]   ;;  %p1724_p9 = por %p1723_p8, %p1722_p7 }
  0x83   :  { %701 = vmatprep.subr.bf16.mxu0 %v1472_v21  ;;  %v1513_v21 = vld [vmem:[#allocation7 + $0x124] ss:$8 sps:$4 sm:$0xff]   ;;  %v1541_v46 = vld [vmem:[#allocation7 + $0x1c0] ss:$8 sps:$4 sm:$0xff]  }
  0x84   :  { %1346 = vmatpush3.bf16.msra.mxu1 %v1556_v47  ;;  %v1546_v47 = vld [vmem:[#allocation7 + $0x1d4] ss:$8 sps:$4 sm:$0xff]   ;;  %v1570_v57 = vld [vmem:[#allocation10 + $0x8] sm:$0xff]   ;;  %p1725_p10 = pnand %p1724_p9, %p1718_p6 }
  0x85   :  { %1347 = vmatprep.subr.bf16.mxu1 %v1557_v48  ;;  %v144_v48 = vrot.slane %v1908_v59, %v143_v45  ;;  %v1565_v59 = vld [vmem:[#allocation8 + $0x70] sm:$0xff]  }
  0x86   :  { %702 = vmatpush1.bf16.msra.mxu0 %v1474_v22 }
  0x87   :  { %703 = vmatprep.subr.bf16.mxu0 %v1475_v23 }
  0x88   :  { %1348 = vmatpush3.bf16.msra.mxu1 %v1558_v49  ;;  %v1544_v49 = vld [vmem:[#allocation7 + $0x1d0] ss:$8 sps:$4 sm:$0xff]  }
  0x89   :  { %1349 = vmatprep.subr.bf16.mxu1 %v1559_v50  ;;  %v1549_v50 = vld [vmem:[#allocation7 + $0x1e4] ss:$8 sps:$4 sm:$0xff]  }
  0x8a   :  { %704 = vmatpush1.bf16.msra.mxu0 %v1477_v24  ;;  %v1511_v24 = vld [vmem:[#allocation7 + $0x120] ss:$8 sps:$4 sm:$0xff]  }
  0x8b   :  { %705 = vmatprep.subr.bf16.mxu0 %v1478_v25 }
  0x8c   :  { %1350 = vmatpush3.bf16.msra.mxu1 %v1560_v51 }
  0x8d   :  { %1351 = vmatprep.subr.bf16.mxu1 %v1561_v52  ;;  %v1547_v52 = vld [vmem:[#allocation7 + $0x1e0] ss:$8 sps:$4 sm:$0xff]  }
  0x8e   :  { %706 = vmatpush1.bf16.msra.mxu0 %v1480_v26  ;;  %v1516_v26 = vld [vmem:[#allocation7 + $0x134] ss:$8 sps:$4 sm:$0xff]  }
  0x8f   :  { %707 = vmatprep.subr.bf16.mxu0 %v1481_v27  ;;  %v1514_v27 = vld [vmem:[#allocation7 + $0x130] ss:$8 sps:$4 sm:$0xff]  }
  0x90   :  { %1352 = vmatpush3.bf16.msra.mxu1 %v1562_v53  ;;  %v1552_v53 = vld [vmem:[#allocation7 + $0x1f4] ss:$8 sps:$4 sm:$0xff]  }
  0x91   :  { %1353 = vmatprep.subr.bf16.mxu1 %v1563_v54 }
  0x92   :  { %708 = vmatpush1.bf16.msra.mxu0 %v1483_v28  ;;  %v1519_v28 = vld [vmem:[#allocation7 + $0x144] ss:$8 sps:$4 sm:$0xff]  }
  0x93   :  { %709 = vmatprep.subr.bf16.mxu0 %v1484_v29  ;;  %v1517_v29 = vld [vmem:[#allocation7 + $0x140] ss:$8 sps:$4 sm:$0xff]  }
  0x94   :  { %1354 = vmatpush3.bf16.msra.mxu1 %v1564_v55  ;;  %v1550_v55 = vld [vmem:[#allocation7 + $0x1f0] ss:$8 sps:$4 sm:$0xff]  }
  0x95   :  { %1355 = vmatprep.subr.bf16.mxu1 %v1565_v59 }
  0x96   :  { %710 = vmatpush1.bf16.msra.mxu0 %v1486_v30  ;;  %v1522_v30 = vld [vmem:[#allocation7 + $0x154] ss:$8 sps:$4 sm:$0xff]  }
  0x97   :  { %711 = vmatprep.subr.bf16.mxu0 %v1487_v31  ;;  %v1520_v31 = vld [vmem:[#allocation7 + $0x150] ss:$8 sps:$4 sm:$0xff]  }
  0x9a   :  { %712 = vmatpush1.bf16.msra.mxu0 %v1489_v32  ;;  %v1525_v32 = vld [vmem:[#allocation7 + $0x164] ss:$8 sps:$4 sm:$0xff]  }
  0x9b   :  { %713 = vmatprep.subr.bf16.mxu0 %v1490_v33  ;;  %v1523_v33 = vld [vmem:[#allocation7 + $0x160] ss:$8 sps:$4 sm:$0xff]  }
  0x9e   :  { %714 = vmatpush1.bf16.msra.mxu0 %v1492_v34  ;;  %v1528_v34 = vld [vmem:[#allocation7 + $0x174] ss:$8 sps:$4 sm:$0xff]  }
  0x9f   :  { %715 = vmatprep.subr.bf16.mxu0 %v1493_v35  ;;  %v1526_v35 = vld [vmem:[#allocation7 + $0x170] ss:$8 sps:$4 sm:$0xff]  }
  0xa2   :  { %716 = vmatpush1.bf16.msra.mxu0 %v1495_v36  ;;  %v1531_v36 = vld [vmem:[#allocation7 + $0x184] ss:$8 sps:$4 sm:$0xff]  }
  0xa3   :  { %717 = vmatprep.subr.bf16.mxu0 %v1496_v37  ;;  %v1529_v37 = vld [vmem:[#allocation7 + $0x180] ss:$8 sps:$4 sm:$0xff]  }
  0xa6   :  { %718 = vmatpush1.bf16.msra.mxu0 %v1498_v38  ;;  %v1534_v38 = vld [vmem:[#allocation7 + $0x194] ss:$8 sps:$4 sm:$0xff]  }
  0xa7   :  { %719 = vmatprep.subr.bf16.mxu0 %v1499_v39  ;;  %v1532_v39 = vld [vmem:[#allocation7 + $0x190] ss:$8 sps:$4 sm:$0xff]  }
  0xaa   :  { %720 = vmatpush1.bf16.msra.mxu0 %v1501_v40  ;;  %v1537_v40 = vld [vmem:[#allocation7 + $0x1a4] ss:$8 sps:$4 sm:$0xff]  }
  0xab   :  { %721 = vmatprep.subr.bf16.mxu0 %v1502_v41  ;;  %v1535_v41 = vld [vmem:[#allocation7 + $0x1a0] ss:$8 sps:$4 sm:$0xff]  }
  0xae   :  { %722 = vmatpush1.bf16.msra.mxu0 %v1504_v42  ;;  %v1540_v42 = vld [vmem:[#allocation7 + $0x1b4] ss:$8 sps:$4 sm:$0xff]  }
  0xaf   :  { %732 = vmatprep.subr.bf16.mxu0 %v1507_v43  ;;  %v1538_v43 = vld [vmem:[#allocation7 + $0x1b0] ss:$8 sps:$4 sm:$0xff]  }
 0x14a   :  { %v231_v63 = vpop.f32.mrb[0].mxu1 }
 0x14b   :  { %v232_v0 = vadd.f32 %v231_v63, %v136_v61  ;;  %v233_v1 = vpop.f32.mrb[1].mxu1  ;;  %v1567_v63 = vld [vmem:[#allocation8 + $0x78] sm:$0xff]  }
 0x14c   :  { %v234_v2 = vadd.f32 %v233_v1, %v140_v62  ;;  %v235_v3 = vpop.f32.mrb[2].mxu1  ;;  %v1566_v62 = vld [vmem:[#allocation8 + $0x30] sm:$0xff]   ;;  %v1762_v1 = vmov 0.0  }
 0x14d   :  { %vm279_vm1 = vcmp.gt.f32.partialorder %v232_v0, 0.0  ;;  %v283_v5 = vmul.f32 0.01, %v232_v0  ;;  %v236_v6 = vpop.f32.mrb[3].mxu1  ;;  %1356 = vmatpush3.bf16.msra.mxu1 %v1566_v62 }
 0x14e   :  { %vm280_vm2 = vcmp.gt.f32.partialorder %v234_v2, 0.0  ;;  %v284_v7 = vmul.f32 0.01, %v234_v2  ;;  %1357 = vmatprep.subr.bf16.mxu1 %v1567_v63 }
 0x14f   :  { %v287_v8 = vsel %vm279_vm1, %v232_v0, %v283_v5  ;;  %v1568_v0 = vld [vmem:[#allocation8 + $0x38] sm:$0xff]  }
 0x150   :  { %v288_v9 = vsel %vm280_vm2, %v234_v2, %v284_v7  ;;  %v291_v13 = vpack.c.bf16 %v287_v8, %v287_v8  ;;  %v359_v2 = vld [vmem:[%s1978_s6 + $0x4] sm:$0x3] }
 0x151   :  { %v292_v11 = vpack.c.bf16 %v288_v9, %v288_v9  ;;  %1358 = vmatpush3.bf16.msra.mxu1 %v1568_v0  ;;  %v364_v3 = vrot.slane %v359_v2, %v135_v58  ;;  %v368_v4 = vrot.slane %v359_v2, %v139_v60  ;;  %v1571_v58 = vld [vmem:[#allocation10 + $0x10] sm:$0xff]   ;;  %v1572_v60 = vld [vmem:[#allocation10 + $0x18] sm:$0xff]  }
 0x152   :  { %v1919_v15 = vpop.f32.mrb[4].mxu1  ;;  %1383 = vmatprep.subr.bf16.mxu1 %v1762_v1 }
 0x153   :  { %723 = vmatprep.mubr.bf16.mxu0 %v292_v11  ;;  %v274_v16 = vpop.f32.mrb[5].mxu1  ;;  %v273_v51 = vadd.f32 %v1919_v15, %v144_v48 }
 0x154   :  { %724 = vmatmul.mubr.bf16.vlgmr.msra.gmra.mrb[0].mxu0 %v291_v13  ;;  %v275_v17 = vadd.f32 %v274_v16, %v148_v10  ;;  %v276_v18 = vpop.f32.mrb[6].mxu1  ;;  %v1569_v16 = vld [vmem:[#allocation10] sm:$0xff]  }
 0x155   :  { %733 = vmatpush1.bf16.msra.mxu0 %v1505_v12  ;;  %v277_v20 = vpop.f32.mrb[7].mxu1  ;;  %v285_v54 = vmul.f32 0.01, %v273_v51  ;;  %vm281_vm4 = vcmp.gt.f32.partialorder %v273_v51, 0.0  ;;  %v1573_v18 = vld [vmem:[#allocation10 + $0x20] sm:$0xff]  }
 0x156   :  { %734 = vmatprep.subr.bf16.mxu0 %v1510_v14  ;;  %vm282_vm3 = vcmp.gt.f32.partialorder %v275_v17, 0.0  ;;  %v286_v22 = vmul.f32 0.01, %v275_v17  ;;  %v1575_v20 = vld [vmem:[#allocation10 + $0x30] sm:$0xff]  }
 0x157   :  { %v289_v56 = vsel %vm281_vm4, %v273_v51, %v285_v54 }
 0x158   :  { %v290_v23 = vsel %vm282_vm3, %v275_v17, %v286_v22  ;;  %v293_v61 = vpack.c.bf16 %v289_v56, %v289_v56 }
 0x159   :  { %735 = vmatpush1.bf16.msra.mxu0 %v1508_v19  ;;  %v294_v25 = vpack.c.bf16 %v290_v23, %v290_v23  ;;  %v1574_v19 = vld [vmem:[#allocation10 + $0x28] sm:$0xff]  }
 0x15a   :  { %736 = vmatprep.subr.bf16.mxu0 %v1513_v21  ;;  %v1576_v21 = vld [vmem:[#allocation10 + $0x38] sm:$0xff]   ;;  %v1308_v23 = vld [vmem:[%s1978_s6 + $0x6] ss:$0 sm:$0xff] }
 0x15b   :  { %764 = vmatprep.mubr.bf16.mxu0 %v294_v25 }
 0x15d   :  { %737 = vmatpush1.bf16.msra.mxu0 %v1511_v24 }
 0x15e   :  { %738 = vmatprep.subr.bf16.mxu0 %v1516_v26 }
 0x161   :  { %739 = vmatpush1.bf16.msra.mxu0 %v1514_v27 }
 0x162   :  { %740 = vmatprep.subr.bf16.mxu0 %v1519_v28 }
 0x165   :  { %741 = vmatpush1.bf16.msra.mxu0 %v1517_v29 }
 0x166   :  { %742 = vmatprep.subr.bf16.mxu0 %v1522_v30 }
 0x169   :  { %743 = vmatpush1.bf16.msra.mxu0 %v1520_v31  ;;  %v1577_v31 = vld [vmem:[#allocation11] sm:$0xff]  }
 0x16a   :  { %744 = vmatprep.subr.bf16.mxu0 %v1525_v32 }
 0x16d   :  { %745 = vmatpush1.bf16.msra.mxu0 %v1523_v33  ;;  %v1578_v33 = vld [vmem:[#allocation11 + $0x8] sm:$0xff]  }
 0x16e   :  { %746 = vmatprep.subr.bf16.mxu0 %v1528_v34  ;;  %v1579_v34 = vld [vmem:[#allocation11 + $0x10] sm:$0xff]  }
 0x171   :  { %747 = vmatpush1.bf16.msra.mxu0 %v1526_v35  ;;  %v1580_v35 = vld [vmem:[#allocation11 + $0x18] sm:$0xff]  }
 0x172   :  { %748 = vmatprep.subr.bf16.mxu0 %v1531_v36  ;;  %v1581_v36 = vld [vmem:[#allocation11 + $0x20] sm:$0xff]  }
 0x175   :  { %749 = vmatpush1.bf16.msra.mxu0 %v1529_v37  ;;  %v1582_v37 = vld [vmem:[#allocation11 + $0x28] sm:$0xff]  }
 0x176   :  { %750 = vmatprep.subr.bf16.mxu0 %v1534_v38  ;;  %v1583_v38 = vld [vmem:[#allocation11 + $0x30] sm:$0xff]  }
 0x179   :  { %751 = vmatpush1.bf16.msra.mxu0 %v1532_v39  ;;  %v1584_v39 = vld [vmem:[#allocation11 + $0x38] sm:$0xff]  }
 0x17a   :  { %752 = vmatprep.subr.bf16.mxu0 %v1537_v40  ;;  %v1325_v40 = vld [vmem:[%s1978_s6 + $0x7] ss:$0 sm:$0xff] }
 0x17d   :  { %753 = vmatpush1.bf16.msra.mxu0 %v1535_v41 }
 0x17e   :  { %754 = vmatprep.subr.bf16.mxu0 %v1540_v42 }
 0x181   :  { %755 = vmatpush1.bf16.msra.mxu0 %v1538_v43 }
 0x182   :  { %756 = vmatprep.subr.bf16.mxu0 %v1543_v44 }
 0x185   :  { %757 = vmatpush1.bf16.msra.mxu0 %v1541_v46 }
 0x186   :  { %758 = vmatprep.subr.bf16.mxu0 %v1546_v47 }
 0x189   :  { %759 = vmatpush1.bf16.msra.mxu0 %v1544_v49  ;;  %v1334_v49 = vld [vmem:[%s1978_s6 + $0x8] ss:$0 sm:$0xff] }
 0x18a   :  { %760 = vmatprep.subr.bf16.mxu0 %v1549_v50 }
 0x18d   :  { %761 = vmatpush1.bf16.msra.mxu0 %v1547_v52 }
 0x18e   :  { %762 = vmatprep.subr.bf16.mxu0 %v1552_v53 }
 0x191   :  { %763 = vmatpush1.bf16.msra.mxu0 %v1550_v55 }
 0x194   :  { %765 = vmatmul.mubr.bf16.vlgmr.msra.gmra.mrb[0].mxu0 %v293_v61 }
 0x267   :  { %v766_v5 = vpop.f32.mrb[0].mxu0 }
 0x268   :  { %v1423_v6 = vadd.f32 %v766_v5, %v364_v3  ;;  %v768_v7 = vpop.f32.mrb[1].mxu0 }
 0x269   :  { %v1424_v8 = vadd.f32 %v768_v7, %v368_v4  ;;  %v770_v9 = vpop.f32.mrb[2].mxu0 }
 0x26a   :  { %vm773_vm5 = vcmp.gt.f32.partialorder %v1423_v6, 0.0  ;;  %v775_v10 = vmul.f32 0.01, %v1423_v6  ;;  %v771_v11 = vpop.f32.mrb[3].mxu0 }
 0x26b   :  { %vm774_vm6 = vcmp.gt.f32.partialorder %v1424_v8, 0.0  ;;  %v776_v12 = vmul.f32 0.01, %v1424_v8 }
 0x26c   :  { %v777_v13 = vsel %vm773_vm5, %v1423_v6, %v775_v10 }
 0x26d   :  { %v778_v14 = vsel %vm774_vm6, %v1424_v8, %v776_v12  ;;  %v779_v17 = vpack.c.bf16 %v777_v13, %v777_v13 }
 0x26e   :  { %v780_v15 = vpack.c.bf16 %v778_v14, %v778_v14 }
 0x270   :  { %948 = vmatprep.mubr.bf16.mxu1 %v780_v15 }
 0x271   :  { %949 = vmatmul.mubr.bf16.vlgmr.msra.gmra.mrb[8].mxu1 %v779_v17 }
 0x272   :  { %1384 = vmatpush3.bf16.msra.mxu1 %v1569_v16  ;;  %1399 = vmatprep.mubr.msk.bf16.mxu1 %vm1763_vm7, %v1762_v1 }
 0x273   :  { %1385 = vmatprep.subr.bf16.mxu1 %v1762_v1 }
 0x276   :  { %1386 = vmatpush3.bf16.msra.mxu1 %v1570_v57 }
 0x277   :  { %1387 = vmatprep.subr.bf16.mxu1 %v1762_v1 }
 0x27a   :  { %1388 = vmatpush3.bf16.msra.mxu1 %v1571_v58 }
 0x27b   :  { %1389 = vmatprep.subr.bf16.mxu1 %v1762_v1 }
 0x27e   :  { %1390 = vmatpush3.bf16.msra.mxu1 %v1572_v60 }
 0x27f   :  { %1391 = vmatprep.subr.bf16.mxu1 %v1762_v1 }
 0x282   :  { %1392 = vmatpush3.bf16.msra.mxu1 %v1573_v18 }
 0x283   :  { %1393 = vmatprep.subr.bf16.mxu1 %v1762_v1 }
 0x286   :  { %1394 = vmatpush3.bf16.msra.mxu1 %v1574_v19 }
 0x287   :  { %1395 = vmatprep.subr.bf16.mxu1 %v1762_v1 }
 0x28a   :  { %1396 = vmatpush3.bf16.msra.mxu1 %v1575_v20 }
 0x28b   :  { %1397 = vmatprep.subr.bf16.mxu1 %v1762_v1 }
 0x28e   :  { %1398 = vmatpush3.bf16.msra.mxu1 %v1576_v21 }
 0x28f   :  { %1403 = vmatprep.subr.bf16.mxu1 %v1762_v1 }
 0x344   :  { %v1359_v22 = vpop.f32.mrb[8].mxu1 }
 0x345   :  { %v1360_v24 = vpop.f32.mrb[9].mxu1 }
 0x346   :  { %v1361_v25 = vadd.f32 %v1360_v24, %v1359_v22  ;;  %v1362_v26 = vpop.f32.mrb[10].mxu1 }
 0x347   :  { %v1363_v27 = vpop.f32.mrb[11].mxu1 }
 0x348   :  { %v951_v28 = vadd.f32 %v1361_v25, %v1308_v23 }
 0x34a   :  { %vm956_vm8 = vcmp.gt.f32.partialorder %v951_v28, 0.0  ;;  %v957_v29 = vmul.f32 0.01, %v951_v28 }
 0x34c   :  { %v958_v30 = vsel %vm956_vm8, %v951_v28, %v957_v29 }
 0x34d   :  { %v959_v32 = vpack.c.bf16 %v958_v30, %v958_v30 }
 0x34f   :  { %1400 = vmatmul.mubr.bf16.vlgmr.msra.gmra.mrb[12].mxu1 %v959_v32 }
 0x350   :  { %1404 = vmatpush3.bf16.msra.mxu1 %v1577_v31  ;;  %1419 = vmatprep.mubr.msk.bf16.mxu1 %vm1763_vm7, %v1762_v1 }
 0x351   :  { %1405 = vmatprep.subr.bf16.mxu1 %v1762_v1 }
 0x354   :  { %1406 = vmatpush3.bf16.msra.mxu1 %v1578_v33 }
 0x355   :  { %1407 = vmatprep.subr.bf16.mxu1 %v1762_v1 }
 0x358   :  { %1408 = vmatpush3.bf16.msra.mxu1 %v1579_v34 }
 0x359   :  { %1409 = vmatprep.subr.bf16.mxu1 %v1762_v1 }
 0x35c   :  { %1410 = vmatpush3.bf16.msra.mxu1 %v1580_v35 }
 0x35d   :  { %1411 = vmatprep.subr.bf16.mxu1 %v1762_v1 }
 0x360   :  { %1412 = vmatpush3.bf16.msra.mxu1 %v1581_v36 }
 0x361   :  { %1413 = vmatprep.subr.bf16.mxu1 %v1762_v1 }
 0x364   :  { %1414 = vmatpush3.bf16.msra.mxu1 %v1582_v37 }
 0x365   :  { %1415 = vmatprep.subr.bf16.mxu1 %v1762_v1 }
 0x368   :  { %1416 = vmatpush3.bf16.msra.mxu1 %v1583_v38 }
 0x369   :  { %1417 = vmatprep.subr.bf16.mxu1 %v1762_v1 }
 0x36c   :  { %1418 = vmatpush3.bf16.msra.mxu1 %v1584_v39 }
 0x422   :  { %v1065_v41 = vpop.f32.mrb[12].mxu1 }
 0x423   :  { %v1066_v42 = vadd.f32 %v1325_v40, %v1065_v41  ;;  %v1401_v43 = vpop.f32.mrb[13].mxu1 }
 0x424   :  { %v1068_v44 = vpop.f32.mrb[14].mxu1 }
 0x425   :  { %vm1071_vm9 = vcmp.gt.f32.partialorder %v1066_v42, 0.0  ;;  %v1072_v45 = vmul.f32 0.01, %v1066_v42  ;;  %v1402_v46 = vpop.f32.mrb[15].mxu1 }
 0x427   :  { %v1073_v47 = vsel %vm1071_vm9, %v1066_v42, %v1072_v45 }
 0x428   :  { %v1074_v48 = vpack.c.bf16 %v1073_v47, %v1073_v47 }
 0x42a   :  { %1420 = vmatmul.mubr.bf16.vlgmr.msra.gmra.mrb[16].mxu1 %v1074_v48 }
 0x4fd   :  { %v1180_v50 = vpop.f32.mrb[16].mxu1 }
 0x4fe   :  { %v1181_v51 = vadd.f32 %v1334_v49, %v1180_v50  ;;  %v1421_v52 = vpop.f32.mrb[17].mxu1 }
 0x4ff   :  { %v1183_v53 = vpop.f32.mrb[18].mxu1 }
 0x500   :  { %vm1186_vm10 = vcmp.gt.f32.partialorder %v1181_v51, 0.0  ;;  %v1187_v54 = vmul.f32 0.01, %v1181_v51  ;;  %v1422_v55 = vpop.f32.mrb[19].mxu1 }
 0x502   :  { %v1188_v56 = vsel %vm1186_vm10, %v1181_v51, %v1187_v54 }
 0x503   :  { %1199 = vst [vmem:[#allocation13] sm:$0xff] %v1188_v56 }
 0x504   :  { %1728 = shalt.err (!%p1725_p10)
}
 0x505   :  { %s1729_s16 = scalar_lea.hbm %s1979_s7, 128 }
 0x506   :  { %p1730_p11 = scmp.ne.s32.totalorder %s1979_s7, %s1729_s16  ;;  %p1733_p12 = scmp.lt.u32.totalorder %s1729_s16, %s1979_s7 }
 0x508   :  { %p1735_p13 = pnand %p1733_p12, %p1730_p11 }
 0x50a   :  { %1738 = shalt.err (!%p1735_p13)
}
 0x50b   :  { %1223 = dma.vmem_to_hbm [thread:$0]  %s1221_s14, 128, %s1979_s7, [#allocation4]  }
 0x50c   :  { %1747 = dma.done.wait [#allocation4], 128  }
 0x50d   :  { %1748 = vsyncadd [#allocation4], 4294967168 }
 0x50e   :  { %1227 = vsyncpa [#allocation3], 1 }
 0x50f   :  { %1228 = vsyncpa [#allocation6], 1 }
 0x510   :  { %1229 = vsyncpa [#allocation9], 1 }
 0x511   :  { %1230 = vsyncpa [#allocation12], 1 }
 0x512   :  { %1231 = vsyncpa [#allocation4], 1 }

</bundles_post_ra>
